<compile_context>
chip_gen: v6e
topology: v6e:2x2x1
jax: 0.10.0
libtpu: 0.0.40
codegen_flags: <defaults>
</compile_context>

<pallas_src>
import itertools
import random

import numpy as np
import jax
import jax.numpy as jnp
from jax import lax
from jax.experimental import pallas as pl
from jax.experimental.pallas import tpu as pltpu


def _ceil_div(a, b):
    return -(-a // b)


def _round_up(a, b):
    return _ceil_div(a, b) * b


# ----------------------------------------------------------------------------
# Host-side triplet sampling (Sampler.randomsampling, 'random' method).
# ----------------------------------------------------------------------------
def random_sampling(labels: np.ndarray, bs: int, seed: int = 0):
    rng = random.Random(seed)
    labels = np.asarray(labels)
    unique_classes = np.unique(labels)
    indices = np.arange(bs)
    class_dict = {c: indices[labels.squeeze() == c] for c in unique_classes}
    trips = [
        list(itertools.product([x], [x], [y for y in unique_classes if x != y]))
        for x in unique_classes
    ]
    trips = [x for y in trips for x in y]
    trips = [
        [t for t in itertools.product(*[class_dict[j] for j in trip]) if t[0] != t[1]]
        for trip in trips
    ]
    trips = [x for y in trips for x in y]
    sampled = rng.sample(trips, bs)
    return np.asarray(sampled, dtype=np.int32)  # (BS, 3) -> (anchor, pos, neg)


# ----------------------------------------------------------------------------
# Pallas kernel: vectorized one-hot-matmul gather + hinge + per-tile partials.
# ----------------------------------------------------------------------------
def _make_triplet_loss_kernel(margin: float, tile_t: int, bs_pad: int,
                              num_triplets: int):
    margin = float(margin)

    def kernel(ia_ref, ip_ref, in_ref, batch_ref, o_ref):
        # ia/ip/in_ref: VMEM (tile_t, 1) int32   -- anchor / positive / negative indices
        # batch_ref:    VMEM (BS_pad, D_pad) f32 -- resident across the grid
        # o_ref:        VMEM (1, 8, 128) f32     -- this tile's partial-sum block
        tile = pl.program_id(0)
        base = tile * tile_t

        batch = batch_ref[...].astype(jnp.float32)              # (BS_pad, D_pad)
        ia = ia_ref[...]                                         # (tile_t, 1)
        ip = ip_ref[...]
        ineg = in_ref[...]

        # One-hot row selectors, then MXU gathers (exact: entries are 0/1).
        cols = lax.broadcasted_iota(jnp.int32, (tile_t, bs_pad), 1)
        oh_a = (cols == ia).astype(jnp.float32)                  # (tile_t, BS_pad)
        oh_p = (cols == ip).astype(jnp.float32)
        oh_n = (cols == ineg).astype(jnp.float32)

        a = jnp.dot(oh_a, batch, preferred_element_type=jnp.float32)  # (tile_t, D_pad)
        p = jnp.dot(oh_p, batch, preferred_element_type=jnp.float32)
        n = jnp.dot(oh_n, batch, preferred_element_type=jnp.float32)

        d_ap = jnp.sum((a - p) * (a - p), axis=-1, keepdims=True)  # (tile_t, 1)
        d_an = jnp.sum((a - n) * (a - n), axis=-1, keepdims=True)  # (tile_t, 1)
        hinge = jnp.maximum(d_ap - d_an + margin, 0.0)             # (tile_t, 1)

        # Mask pad triplets (they would otherwise add relu(margin)).
        row = lax.broadcasted_iota(jnp.int32, (tile_t, 1), 0) + base
        hinge = jnp.where(row < num_triplets, hinge, 0.0)

        partial = jnp.sum(hinge, axis=(0, 1), keepdims=True)       # (1, 1)
        # Lane-dense, unmasked store of this tile's partial sum.
        o_ref[0, :, :] = jnp.broadcast_to(partial, (8, 128))

    return kernel


def triplet_loss_pallas(batch: jax.Array, triplets: jax.Array,
                        margin: float, tile_t: int = 256) -> jax.Array:
    """batch: (BS, D); triplets: (T, 3) int32 indices. Returns scalar loss."""
    T = int(triplets.shape[0])
    BS, D = batch.shape
    D_pad = _round_up(max(int(D), 1), 128)    # lane-dense embed dim
    BS_pad = _round_up(max(int(BS), 1), 8)    # sublane-aligned rows
    tile_t = max(8, min(_round_up(int(tile_t), 8), _round_up(T, 8)))
    num_tiles = _ceil_div(T, tile_t)
    T_pad = num_tiles * tile_t

    batch_p = jnp.pad(batch.astype(jnp.float32),
                      ((0, BS_pad - BS), (0, D_pad - D)))
    trip = jnp.asarray(triplets, jnp.int32)
    idx = jnp.zeros((T_pad, 3), jnp.int32).at[:T, :].set(trip)
    ia = idx[:, 0:1]
    ip = idx[:, 1:2]
    ineg = idx[:, 2:3]

    kernel = _make_triplet_loss_kernel(margin, tile_t, BS_pad, T)

    batch_bytes = BS_pad * D_pad * 4
    work_bytes = 3 * tile_t * BS_pad * 4 + 6 * tile_t * D_pad * 4
    vmem_limit = int(min(64 * 1024 * 1024,
                         max(8 * 1024 * 1024,
                             2 * batch_bytes + work_bytes + 2 * 1024 * 1024)))

    idx_spec = pl.BlockSpec((tile_t, 1), lambda i: (i, 0))
    out = pl.pallas_call(
        kernel,
        out_shape=jax.ShapeDtypeStruct((num_tiles, 8, 128), jnp.float32),
        grid_spec=pltpu.PrefetchScalarGridSpec(
            num_scalar_prefetch=0,
            grid=(num_tiles,),
            in_specs=[idx_spec, idx_spec, idx_spec,
                      pl.BlockSpec((BS_pad, D_pad), lambda i: (0, 0))],
            out_specs=pl.BlockSpec((1, 8, 128), lambda i: (i, 0, 0)),
        ),
        compiler_params=pltpu.CompilerParams(
            dimension_semantics=("parallel",),
            vmem_limit_bytes=vmem_limit),
    )(ia, ip, ineg, batch_p)

    # Finish the batch mean over triplets in the wrapper (partials per tile).
    return jnp.sum(out[:, 0, 0]) / T


# ----------------------------------------------------------------------------
# TripletLoss forward: host sampling (glue) + fused Pallas gather/compute.
# ----------------------------------------------------------------------------
def triplet_loss_forward(batch: jax.Array, labels: np.ndarray,
                         margin: float = 1.0, seed: int = 0) -> jax.Array:
    bs = batch.shape[0]
    triplets = random_sampling(labels, bs, seed=seed)   # (BS, 3) index array
    return triplet_loss_pallas(batch, jnp.asarray(triplets), margin)


# Pure-JAX reference (mirrors the PyTorch math) for a sanity check.
def _reference_loss(batch, triplets, margin):
    a = batch[triplets[:, 0]]
    p = batch[triplets[:, 1]]
    n = batch[triplets[:, 2]]
    d_ap = jnp.sum((a - p) ** 2, axis=-1)
    d_an = jnp.sum((a - n) ** 2, axis=-1)
    return jnp.mean(jnp.maximum(d_ap - d_an + margin, 0.0))


if __name__ == "__main__":
    # Small deterministic example: BS=8 embeddings of dim 32, 4 classes x 2.
    key = jax.random.PRNGKey(0)
    BS, D = 8, 32
    batch = jax.random.normal(key, (BS, D), dtype=jnp.float32)
    labels = np.array([0, 0, 1, 1, 2, 2, 3, 3], dtype=np.int64).reshape(BS, 1)

    margin = 1.0
    loss = triplet_loss_forward(batch, labels, margin=margin, seed=0)
    loss = jax.block_until_ready(loss)

    # Cross-check against pure-JAX reference using the same sampled triplets.
    triplets = random_sampling(labels, BS, seed=0)
    ref = jax.block_until_ready(
        _reference_loss(batch, jnp.asarray(triplets), margin))
    np.testing.assert_allclose(np.asarray(loss), np.asarray(ref),
                               rtol=1e-5, atol=1e-5)

    print("KERNEL_OK")
</pallas_src>

<mosaic_0001>
module attributes {stable_mosaic.version = 11 : i64} {
  func.func @kernel(%arg0: i32, %arg1: memref<8x1xi32, #tpu.memory_space<vmem>>, %arg2: memref<8x1xi32, #tpu.memory_space<vmem>>, %arg3: memref<8x1xi32, #tpu.memory_space<vmem>>, %arg4: memref<8x128xf32, #tpu.memory_space<vmem>>, %arg5: memref<1x8x128xf32, #tpu.memory_space<vmem>>) attributes {dimension_semantics = [#tpu.dimension_semantics<parallel>], iteration_bounds = array<i64: 1>, scalar_prefetch = 0 : i64, scratch_operands = 0 : i64, tpu.core_type = #tpu.core_type<tc>, window_params = [{transform_indices = @transform_0, window_bounds = array<i64: 8, 1>}, {transform_indices = @transform_1, window_bounds = array<i64: 8, 1>}, {transform_indices = @transform_2, window_bounds = array<i64: 8, 1>}, {pipeline_mode = #tpu.pipeline_mode<synchronous>, transform_indices = @transform_3, window_bounds = array<i64: 8, 128>}, {transform_indices = @transform_4, window_bounds = array<i64: 1, 8, 128>}]} {
    %c8_i32 = arith.constant 8 : i32
    %0 = arith.muli %arg0, %c8_i32 : i32
    %c0 = arith.constant 0 : index
    %c0_0 = arith.constant 0 : index
    %1 = vector.load %arg4[%c0, %c0_0] : memref<8x128xf32, #tpu.memory_space<vmem>>, vector<8x128xf32>
    %c0_1 = arith.constant 0 : index
    %c0_2 = arith.constant 0 : index
    %2 = vector.load %arg1[%c0_1, %c0_2] : memref<8x1xi32, #tpu.memory_space<vmem>>, vector<8x1xi32>
    %c0_3 = arith.constant 0 : index
    %c0_4 = arith.constant 0 : index
    %3 = vector.load %arg2[%c0_3, %c0_4] : memref<8x1xi32, #tpu.memory_space<vmem>>, vector<8x1xi32>
    %c0_5 = arith.constant 0 : index
    %c0_6 = arith.constant 0 : index
    %4 = vector.load %arg3[%c0_5, %c0_6] : memref<8x1xi32, #tpu.memory_space<vmem>>, vector<8x1xi32>
    %5 = tpu.iota {dimensions = array<i32: 1>} : vector<8x8xi32>
    %6 = vector.broadcast %2 : vector<8x1xi32> to vector<8x8xi32>
    %7 = arith.cmpi eq, %5, %6 : vector<8x8xi32>
    %8 = arith.extui %7 : vector<8x8xi1> to vector<8x8xi32>
    %9 = arith.sitofp %8 : vector<8x8xi32> to vector<8x8xf32>
    %10 = vector.broadcast %3 : vector<8x1xi32> to vector<8x8xi32>
    %11 = arith.cmpi eq, %5, %10 : vector<8x8xi32>
    %12 = arith.extui %11 : vector<8x8xi1> to vector<8x8xi32>
    %13 = arith.sitofp %12 : vector<8x8xi32> to vector<8x8xf32>
    %14 = vector.broadcast %4 : vector<8x1xi32> to vector<8x8xi32>
    %15 = arith.cmpi eq, %5, %14 : vector<8x8xi32>
    %16 = arith.extui %15 : vector<8x8xi1> to vector<8x8xi32>
    %17 = arith.sitofp %16 : vector<8x8xi32> to vector<8x8xf32>
    %cst = arith.constant dense<0.000000e+00> : vector<8x128xf32>
    %18 = tpu.matmul %9, %1, %cst {dimension_numbers = #tpu.dot_dimension_numbers<[1], [0], [0], [1], [0, 0, 1, 1], [], []>} : vector<8x8xf32>, vector<8x128xf32>, vector<8x128xf32> -> vector<8x128xf32>
    %cst_7 = arith.constant dense<0.000000e+00> : vector<8x128xf32>
    %19 = tpu.matmul %13, %1, %cst_7 {dimension_numbers = #tpu.dot_dimension_numbers<[1], [0], [0], [1], [0, 0, 1, 1], [], []>} : vector<8x8xf32>, vector<8x128xf32>, vector<8x128xf32> -> vector<8x128xf32>
    %cst_8 = arith.constant dense<0.000000e+00> : vector<8x128xf32>
    %20 = tpu.matmul %17, %1, %cst_8 {dimension_numbers = #tpu.dot_dimension_numbers<[1], [0], [0], [1], [0, 0, 1, 1], [], []>} : vector<8x8xf32>, vector<8x128xf32>, vector<8x128xf32> -> vector<8x128xf32>
    %21 = arith.subf %18, %19 : vector<8x128xf32>
    %22 = arith.subf %18, %19 : vector<8x128xf32>
    %23 = arith.mulf %21, %22 : vector<8x128xf32>
    %cst_9 = arith.constant dense<0.000000e+00> : vector<8xf32>
    %24 = vector.multi_reduction <add>, %23, %cst_9 [1] : vector<8x128xf32> to vector<8xf32>
    %25 = vector.shape_cast %24 : vector<8xf32> to vector<8x1xf32>
    %26 = arith.subf %18, %20 : vector<8x128xf32>
    %27 = arith.subf %18, %20 : vector<8x128xf32>
    %28 = arith.mulf %26, %27 : vector<8x128xf32>
    %cst_10 = arith.constant dense<0.000000e+00> : vector<8xf32>
    %29 = vector.multi_reduction <add>, %28, %cst_10 [1] : vector<8x128xf32> to vector<8xf32>
    %30 = vector.shape_cast %29 : vector<8xf32> to vector<8x1xf32>
    %31 = arith.subf %25, %30 : vector<8x1xf32>
    %cst_11 = arith.constant 1.000000e+00 : f32
    %32 = vector.broadcast %cst_11 : f32 to vector<8x1xf32>
    %33 = arith.addf %31, %32 : vector<8x1xf32>
    %cst_12 = arith.constant 0.000000e+00 : f32
    %34 = vector.broadcast %cst_12 : f32 to vector<8x1xf32>
    %35 = arith.maximumf %33, %34 : vector<8x1xf32>
    %36 = tpu.iota {dimensions = array<i32: 0>} : vector<8x1xi32>
    %37 = vector.broadcast %0 : i32 to vector<8x1xi32>
    %38 = arith.addi %36, %37 : vector<8x1xi32>
    %c8_i32_13 = arith.constant 8 : i32
    %39 = vector.broadcast %c8_i32_13 : i32 to vector<8x1xi32>
    %40 = arith.cmpi slt, %38, %39 : vector<8x1xi32>
    %cst_14 = arith.constant 0.000000e+00 : f32
    %41 = vector.broadcast %cst_14 : f32 to vector<8x1xf32>
    %42 = arith.select %40, %35, %41 : vector<8x1xi1>, vector<8x1xf32>
    %43 = vector.shape_cast %42 : vector<8x1xf32> to vector<1x8x1xf32>
    %cst_15 = arith.constant dense<0.000000e+00> : vector<1xf32>
    %44 = vector.multi_reduction <add>, %43, %cst_15 [1, 2] : vector<1x8x1xf32> to vector<1xf32>
    %45 = vector.shape_cast %44 : vector<1xf32> to vector<1x1x1xf32>
    %46 = vector.extract %45[0, 0, 0] : f32 from vector<1x1x1xf32>
    %47 = vector.broadcast %46 : f32 to vector<1x1xf32>
    %48 = vector.shape_cast %47 : vector<1x1xf32> to vector<1x1xf32>
    %49 = vector.broadcast %48 : vector<1x1xf32> to vector<8x128xf32>
    %c0_16 = arith.constant 0 : index
    %c0_17 = arith.constant 0 : index
    %c0_18 = arith.constant 0 : index
    %50 = vector.load %arg5[%c0_16, %c0_17, %c0_18] : memref<1x8x128xf32, #tpu.memory_space<vmem>>, vector<1x8x128xf32>
    %51 = vector.shape_cast %50 : vector<1x8x128xf32> to vector<8x128xf32>
    %52 = vector.shape_cast %49 : vector<8x128xf32> to vector<1x8x128xf32>
    tpu.vector_store %arg5[%c0_16, %c0_17, %c0_18], %52 {strides = array<i32>} : memref<1x8x128xf32, #tpu.memory_space<vmem>>, vector<1x8x128xf32>,
    return
  }
  func.func @transform_0(%arg0: i32) -> (i32, i32) {
    %c0_i32 = arith.constant 0 : i32
    %c0_i32_0 = arith.constant 0 : i32
    return %arg0, %c0_i32 : i32, i32
  }
  func.func @transform_1(%arg0: i32) -> (i32, i32) {
    %c0_i32 = arith.constant 0 : i32
    %c0_i32_0 = arith.constant 0 : i32
    return %arg0, %c0_i32 : i32, i32
  }
  func.func @transform_2(%arg0: i32) -> (i32, i32) {
    %c0_i32 = arith.constant 0 : i32
    %c0_i32_0 = arith.constant 0 : i32
    return %arg0, %c0_i32 : i32, i32
  }
  func.func @transform_3(%arg0: i32) -> (i32, i32) {
    %c0_i32 = arith.constant 0 : i32
    %c0_i32_0 = arith.constant 0 : i32
    %c0_i32_1 = arith.constant 0 : i32
    return %c0_i32, %c0_i32_0 : i32, i32
  }
  func.func @transform_4(%arg0: i32) -> (i32, i32, i32) {
    %c0_i32 = arith.constant 0 : i32
    %c0_i32_0 = arith.constant 0 : i32
    %c0_i32_1 = arith.constant 0 : i32
    return %arg0, %c0_i32, %c0_i32_0 : i32, i32, i32
  }
}

</mosaic_0001>

<bundles_post_ra>
// kernel: tpu_custom_call.1
= control target key start
LH: loop header
LB: loop body
LE: loop exit
PB: predicated region body
PF: predicated region fallthrough
CT: control target
= control target key end

     0   :  { %v364_v2 = vmov 0   ;;  %s411_s0 = inlined_call_operand.vmem [shape: s32[8,1], index: 0, kind: input, shape index: {}]   ;;  %s412_s1 = inlined_call_operand.vmem [shape: s32[8,1], index: 1, kind: input, shape index: {}]   ;;  %s413_s2 = inlined_call_operand.vmem [shape: s32[8,1], index: 2, kind: input, shape index: {}]   ;;  %s414_s3 = inlined_call_operand.vmem [shape: f32[8,128], index: 3, kind: input, shape index: {}]   ;;  %s415_s4 = inlined_call_operand.hbm [shape: f32[1,8,128], index: 4, kind: output, shape index: {}]  }
   0x1   :  { %v20_v0 = vld [vmem:[%s411_s0] sm:$0xff]  ;;  %340 = vset.pattern.permute.xlu0 %v364_v2  ;;  %341 = vset.pattern.permute.xlu1 %v364_v2 }
   0x2   :  { %v22_v1 = vld [vmem:[%s413_s2] sm:$0xff] }
   0x3   :  { %v19_v3 = vld [vmem:[%s414_s3] sm:$0xff] }
   0x4   :  { %9 = vsyncpa [#allocation3], 0  ;;  %26 = vperm.xlu0 %340, %v20_v0   ;;  %38 = vperm.xlu1 %341, %v22_v1   ;;  %v21_v4 = vld [vmem:[%s412_s1] sm:$0xff]  ;;  %v365_v5 = vmov 0.0   ;;  %vm366_vm0 = vmmov 0   ;;  %v23_v6 = vlaneseq  ;;  %vm43_vm1 = vcmask 64512  }
   0x5   :  { %319 = vmatprep.subr.mxu0 %v365_v5  ;;  %321 = vmatprep.mubr.msk.f32.mxu0 %vm366_vm0, %v365_v5  ;;  %vm280_vm5 = vcmask 7168   ;;  %s367_s0 = smov [#allocation2]  }
   0x6   :  { %320 = vmatpush3.msra.mxu0 %v19_v3  ;;  %324 = vmatprep.subr.mxu1 %v365_v5  ;;  %v24_v7 = vand.u32 127, %v23_v6  ;;  %s299_s1 = sshll.u32 %s367_s0, 4  ;;  %s300_s1 = int_to_ptr.vmem [resolvable:$true] %s299_s1 }
   0x7   :  { %329 = vmatprep.subr.mxu0 %v365_v5  ;;  %325 = vmatpush3.msra.mxu1 %v19_v3  ;;  %s342_s3 = scalar_lea.vmem %s300_s1, 128  ;;  %p347_p1 = scmp.lt.s32.totalorder %s300_s1, %s300_s1 }
   0x8   :  { %32 = vperm.xlu0 %340, %v21_v4   ;;  %326 = vmatprep.mubr.msk.f32.mxu1 %vm366_vm0, %v365_v5  ;;  %p343_p0 = scmp.ne.s32.totalorder %s300_s1, %s342_s3  ;;  %p348_p2 = scmp.lt.s32.totalorder %s342_s3, %s342_s3 }
   0xa   :  { %p349_p3 = por %p348_p2, %p347_p1 }
   0xc   :  { %p350_p4 = pnand %p349_p3, %p343_p0 }
  0x7f   :  { %v27_v8 = vpop.permute.xlu0 %26  ;;  %v39_v9 = vpop.permute.xlu1 %38 }
  0x80   :  { %vm28_vm2 = vcmp.eq.s32.totalorder %v24_v7, %v27_v8  ;;  %vm40_vm3 = vcmp.eq.s32.totalorder %v24_v7, %v39_v9 }
  0x81   :  { %v307_v10 = vsel %vm28_vm2, 1.0, %v365_v5  ;;  %v309_v11 = vsel %vm40_vm3, 1.0, %v365_v5 }
  0x82   :  { %322 = vmatmul.mubr.msk.f32.vlgmr.msra.gmra.mxu0 %vm43_vm1, %v307_v10 }
  0x83   :  { %330 = vmatpush3.msra.mxu0 %v19_v3  ;;  %v33_v12 = vpop.permute.xlu0 %32  ;;  %331 = vmatprep.mubr.msk.f32.mxu0 %vm366_vm0, %v365_v5 }
  0x84   :  { %vm34_vm4 = vcmp.eq.s32.totalorder %v24_v7, %v33_v12 }
  0x85   :  { %v308_v13 = vsel %vm34_vm4, 1.0, %v365_v5 }
  0x86   :  { %327 = vmatmul.mubr.msk.f32.vlgmr.msra.gmra.mxu1 %vm43_vm1, %v308_v13  ;;  %332 = vmatmul.mubr.msk.f32.vlgmr.msra.gmra.mxu0 %vm43_vm1, %v309_v11 }
 0x142   :  { %v113_v14 = vpop.f32.mrf.mxu0 }
 0x144   :  { %v323_v15 = vpop.f32.mrf.mxu0 }
 0x146   :  { %v186_v16 = vpop.f32.mrf.mxu1  ;;  %v259_v17 = vpop.f32.mrf.mxu0 }
 0x147   :  { %v263_v18 = vsub.f32 %v113_v14, %v186_v16  ;;  %v267_v19 = vsub.f32 %v113_v14, %v259_v17 }
 0x148   :  { %v328_v20 = vpop.f32.mrf.mxu1  ;;  %v333_v21 = vpop.f32.mrf.mxu0 }
 0x149   :  { %v264_v22 = vmul.f32 %v263_v18, %v263_v18  ;;  %v268_v23 = vmul.f32 %v267_v19, %v267_v19 }
 0x14b   :  { %265 = vadd.xlane.f32.xlu1 %v264_v22  ;;  %269 = vadd.xlane.f32.xlu0 %v268_v23 }
 0x1d4   :  { %v266_v24 = vpop.xlane.xlu1 %265  ;;  %v270_v25 = vpop.xlane.xlu0 %269 }
 0x1d5   :  { %v271_v26 = vsub.f32 %v266_v24, %v270_v25 }
 0x1d7   :  { %v272_v27 = vadd.f32 1.0, %v271_v26 }
 0x1d9   :  { %v273_v28 = vmax.f32 %v272_v27, 0.0 }
 0x1db   :  { %v281_v29 = vsel %vm280_vm5, %v273_v28, 0.0 }
 0x1dc   :  { %282 = vadd.xlane.f32.xlu0 %v281_v29 }
 0x265   :  { %v283_v30 = vpop.xlane.xlu0 %282 }
 0x266   :  { %v284_v31 = vrot.slane %v283_v30, 4 }
 0x268   :  { %v285_v32 = vadd.f32 %v284_v31, %v283_v30 }
 0x26a   :  { %v286_v33 = vrot.slane %v285_v32, 2 }
 0x26c   :  { %v287_v34 = vadd.f32 %v286_v33, %v285_v32 }
 0x26e   :  { %v288_v35 = vrot.slane %v287_v34, 1 }
 0x270   :  { %v289_v36 = vadd.f32 %v288_v35, %v287_v34 }
 0x272   :  { %334 = vpush %v289_v36 }
 0x2a3   :  { %s335_s2 = spop %334 }
 0x2a4   :  { %v291_v37 = vstv %s335_s2 }
 0x2a5   :  { %292 = vst [vmem:[#allocation2] sm:$0xff] %v291_v37 }
 0x2a6   :  { %353 = shalt.err (!%p350_p4)
}
 0x2a7   :  { %302 = dma.vmem_to_hbm [thread:$0]  %s300_s1, 128, %s415_s4, [#allocation3]  }
 0x2a8   :  { %362 = dma.done.wait [#allocation3], 128  }
 0x2a9   :  { %363 = vsyncadd [#allocation3], 4294967168 }
 0x2aa   :  { %306 = vsyncpa [#allocation3], 1 }

</bundles_post_ra>
